<compile_context>
chip_gen: v7x
topology: tpu7x:2x2x1
jax: 0.10.0
libtpu: 0.0.40
codegen_flags: <defaults>
</compile_context>

<pallas_src>
import functools
import math

import numpy as np
import jax
import jax.numpy as jnp
from jax.experimental import pallas as pl
from jax.experimental.pallas import tpu as pltpu


# ----------------------------------------------------------------------------
# VMEM budget: raise the scoped limit (defaults are 16/32 MiB) and re-derive it
# per generation (v7x only has 64 MiB of physical VMEM, v5e/v6e have 128 MiB).
# ----------------------------------------------------------------------------
def _default_vmem_limit():
    try:
        info = pltpu.get_tpu_info()
        cap = getattr(info, "vmem_capacity_bytes", None)
        if cap:
            return int(min(cap * 3 // 4, 96 * 1024 * 1024))
    except Exception:
        pass
    return 48 * 1024 * 1024  # safe on v5e/v6e (128 MiB) and on v7x (64 MiB)


_VMEM_LIMIT = _default_vmem_limit()


def _round_up(x, m):
    return (x + m - 1) // m * m


def _pick_block_rows(rows, row_bytes, target_bytes=4 << 20, cap=4096):
    """Largest multiple-of-8 row block such that one buffer is ~target_bytes."""
    bm = (target_bytes // max(row_bytes, 1)) // 8 * 8
    bm = max(8, min(cap, bm))
    return int(min(bm, _round_up(rows, 8)))


def _compiler_params():
    return pltpu.CompilerParams(dimension_semantics=("parallel",),
                                vmem_limit_bytes=_VMEM_LIMIT)


# ----------------------------------------------------------------------------
# Kernel 1: (residual add +) LayerNorm over the last dim of a (rows, C) slab.
# ----------------------------------------------------------------------------
def _ln_apply(x, gb_ref, o_ref, eps):
    mean = jnp.mean(x, axis=-1, keepdims=True)
    xc = x - mean                                      # compute (x - mean) once
    var = jnp.mean(xc * xc, axis=-1, keepdims=True)
    inv = jax.lax.rsqrt(var + eps)                     # EUP rsqrt, no sqrt+div
    g = gb_ref[0:1, :].astype(jnp.float32)
    b = gb_ref[1:2, :].astype(jnp.float32)
    o_ref[...] = (xc * inv * g + b).astype(o_ref.dtype)


def _ln_kernel(x_ref, gb_ref, o_ref, *, eps):
    _ln_apply(x_ref[...].astype(jnp.float32), gb_ref, o_ref, eps)


def _add_ln_kernel(x_ref, r_ref, gb_ref, o_ref, *, eps):
    x = x_ref[...].astype(jnp.float32) + r_ref[...].astype(jnp.float32)
    _ln_apply(x, gb_ref, o_ref, eps)


def layer_norm_pallas(x2d, gb, residual=None, eps=1e-5):
    """LayerNorm over the last dim of (rows, C); gb = stacked (2, C) [gamma; beta].

    Optionally fuses a residual add (LN(x + residual)), saving an HBM pass.
    """
    rows, C = x2d.shape
    bm = _pick_block_rows(rows, C * x2d.dtype.itemsize)
    grid = (pl.cdiv(rows, bm),)
    row_spec = pl.BlockSpec((bm, C), lambda i: (i, 0))
    gb_spec = pl.BlockSpec((2, C), lambda i: (0, 0))     # resident across grid
    if residual is None:
        kernel = functools.partial(_ln_kernel, eps=eps)
        in_specs = [row_spec, gb_spec]
        args = (x2d, gb)
    else:
        kernel = functools.partial(_add_ln_kernel, eps=eps)
        in_specs = [row_spec, row_spec, gb_spec]
        args = (x2d, residual, gb)
    return pl.pallas_call(
        kernel,
        out_shape=jax.ShapeDtypeStruct((rows, C), x2d.dtype),
        grid_spec=pltpu.PrefetchScalarGridSpec(
            num_scalar_prefetch=0, grid=grid,
            in_specs=in_specs, out_specs=row_spec),
        compiler_params=_compiler_params(),
    )(*args)


# ----------------------------------------------------------------------------
# Kernel 2: bias + activation fused matmul (Linear layers, Conv1d via im2col).
# ----------------------------------------------------------------------------
def _linear_kernel(x_ref, w_ref, b_ref, o_ref, *, activation):
    x = x_ref[...].astype(jnp.float32)
    w = w_ref[...].astype(jnp.float32)
    y = jnp.dot(x, w, preferred_element_type=jnp.float32)
    y = y + b_ref[...].astype(jnp.float32)
    if activation == 'relu':
        y = jnp.maximum(y, 0.0)
    elif activation == 'leaky_relu':
        y = jnp.where(y >= 0.0, y, 0.2 * y)
    o_ref[...] = y.astype(o_ref.dtype)


def linear_pallas(x2d, w, b, activation=None):
    """y = act(x2d @ w + b). Rows blocked; weight/bias resident across the grid."""
    M, K = x2d.shape
    Kw, N = w.shape
    assert K == Kw
    b2d = b.reshape(1, N)
    bm = _pick_block_rows(M, (K + N) * x2d.dtype.itemsize)
    grid = (pl.cdiv(M, bm),)
    return pl.pallas_call(
        functools.partial(_linear_kernel, activation=activation),
        out_shape=jax.ShapeDtypeStruct((M, N), x2d.dtype),
        grid_spec=pltpu.PrefetchScalarGridSpec(
            num_scalar_prefetch=0, grid=grid,
            in_specs=[pl.BlockSpec((bm, K), lambda i: (i, 0)),
                      pl.BlockSpec((K, N), lambda i: (0, 0)),
                      pl.BlockSpec((1, N), lambda i: (0, 0))],
            out_specs=pl.BlockSpec((bm, N), lambda i: (i, 0))),
        compiler_params=_compiler_params(),
    )(x2d, w, b2d)


def conv1d_pallas(x, w_mat, b, kernel_size, activation=None):
    """Conv1d over time as im2col + Pallas matmul (runs on the MXU).

    x: (B, T, Cin); w_mat: (kernel_size*Cin, Cout), rows ordered (k, Cin).
    Same-padding for odd kernel_size (matches Conv1d(padding=(k-1)//2)).
    """
    B, T, Cin = x.shape
    assert kernel_size % 2 == 1
    pad = (kernel_size - 1) // 2
    xp = jnp.pad(x, ((0, 0), (pad, pad), (0, 0)))
    patches = jnp.concatenate([xp[:, k:k + T, :] for k in range(kernel_size)],
                              axis=-1)                         # (B, T, K*Cin)
    Cout = w_mat.shape[1]
    y = linear_pallas(patches.reshape(B * T, kernel_size * Cin), w_mat, b,
                      activation=activation)
    return y.reshape(B, T, Cout)


# ----------------------------------------------------------------------------
# Kernel 3: masked scaled-dot-product attention (one head/batch per grid step).
# ----------------------------------------------------------------------------
def _attn_kernel(q_ref, k_ref, v_ref, bias_ref, o_ref, *, scale):
    q = q_ref[0].astype(jnp.float32)          # (Lq, dk)
    k = k_ref[0].astype(jnp.float32)          # (Lk, dk)
    v = v_ref[0].astype(jnp.float32)          # (Lk, dv)
    s = jax.lax.dot_general(q, k, (((1,), (1,)), ((), ())),
                            preferred_element_type=jnp.float32)
    s = s * scale + bias_ref[0]
    m = jnp.max(s, axis=-1, keepdims=True)
    p = jnp.exp(s - m)
    denom = jnp.sum(p, axis=-1, keepdims=True)
    o = jnp.dot(p, v, preferred_element_type=jnp.float32)
    o_ref[0] = (o / denom).astype(o_ref.dtype)


def attention_pallas(q, k, v, bias, scale):
    """q,k,v: (BH, L, d); bias: (BH, Lq, Lk) additive mask (-1e30 at masked keys)."""
    BH, Lq, dk = q.shape
    _, Lk, dv = v.shape

    def blk(a, c):
        return pl.BlockSpec((1, a, c), lambda i: (i, 0, 0))

    return pl.pallas_call(
        functools.partial(_attn_kernel, scale=scale),
        out_shape=jax.ShapeDtypeStruct((BH, Lq, dv), q.dtype),
        grid_spec=pltpu.PrefetchScalarGridSpec(
            num_scalar_prefetch=0, grid=(BH,),
            in_specs=[blk(Lq, dk), blk(Lk, dk), blk(Lk, dv), blk(Lq, Lk)],
            out_specs=blk(Lq, dv)),
        compiler_params=_compiler_params(),
    )(q, k, v, bias)


# ----------------------------------------------------------------------------
# Model glue (plain jnp): masks, positional table, params, forward pass.
# ----------------------------------------------------------------------------
def sinusoid_encoding_table(seq_len, d_hid):
    position = np.arange(seq_len, dtype=np.float64)[:, None]
    hid = np.arange(d_hid)[None, :]
    table = position / np.power(10000.0, 2.0 * (hid // 2) / d_hid)
    table[:, 0::2] = np.sin(table[:, 0::2])
    table[:, 1::2] = np.cos(table[:, 1::2])
    return jnp.asarray(table, dtype=jnp.float32)


def get_mask_from_lengths(lengths, max_len):
    ids = jnp.arange(max_len)[None, :]
    return ids >= lengths[:, None]          # True = padded


def _linear_init(key, fan_in, fan_out):
    kw, kb = jax.random.split(key)
    bound = 1.0 / math.sqrt(fan_in)
    w = jax.random.uniform(kw, (fan_in, fan_out), jnp.float32, -bound, bound)
    b = jax.random.uniform(kb, (fan_out,), jnp.float32, -bound, bound)
    return w, b


def _ln_init(dim):
    return jnp.stack([jnp.ones((dim,), jnp.float32),
                      jnp.zeros((dim,), jnp.float32)])


def _init_fft_layer(key, fft_cfg):
    d = fft_cfg['hidden_dim']
    f = fft_cfg['filter_num']
    k = fft_cfg['kernel_size']
    keys = jax.random.split(key, 6)
    wq, bq = _linear_init(keys[0], d, d)
    wk, bk = _linear_init(keys[1], d, d)
    wv, bv = _linear_init(keys[2], d, d)
    fcw, fcb = _linear_init(keys[3], d, d)
    w1, b1 = _linear_init(keys[4], k * d, f)     # Conv1d d -> filter (im2col form)
    w2, b2 = _linear_init(keys[5], k * f, d)     # Conv1d filter -> d
    return {
        'attn': {'wq': wq, 'bq': bq, 'wk': wk, 'bk': bk, 'wv': wv, 'bv': bv,
                 'fc_w': fcw, 'fc_b': fcb, 'ln_gb': _ln_init(d)},
        'conv': {'w1': w1, 'b1': b1, 'w2': w2, 'b2': b2, 'ln_gb': _ln_init(d)},
    }


def init_fastspeech_params(key, cfg, embed_dim):
    max_word = cfg['max_seq_len'] + 1
    pho, fuse, lcfg = cfg['pho_config'], cfg['fuse_config'], cfg['len_config']
    keys = jax.random.split(key, 8)
    embed = 0.1 * jax.random.normal(keys[0], (pho['word_num'], pho['word_dim']),
                                    jnp.float32)
    embed = embed.at[pho['padding_idx']].set(0.0)
    enc_layers = [_init_fft_layer(k, pho['FFT'])
                  for k in jax.random.split(keys[1], pho['n_layers'])]
    wd, fn, lk = pho['word_dim'], lcfg['filter_num'], lcfg['kernel_size']
    lkeys = jax.random.split(keys[2], 3)
    c1w, c1b = _linear_init(lkeys[0], lk * wd, fn)
    c2w, c2b = _linear_init(lkeys[1], lk * fn, fn)
    lw, lb = _linear_init(lkeys[2], fn, 1)
    dec_layers = [_init_fft_layer(k, fuse['FFT'])
                  for k in jax.random.split(keys[3], fuse['n_layers'])]
    mw, mb = _linear_init(keys[4], fuse['word_dim'], embed_dim)
    return {
        'pho_encoder': {'embed': embed,
                        'pos_enc': sinusoid_encoding_table(max_word, pho['word_dim']),
                        'layers': enc_layers},
        'length_adaptor': {'c1_w': c1w, 'c1_b': c1b, 'ln1_gb': _ln_init(fn),
                           'c2_w': c2w, 'c2_b': c2b, 'ln2_gb': _ln_init(fn),
                           'lin_w': lw, 'lin_b': lb},
        'fuse_decoder': {'pos_enc': sinusoid_encoding_table(max_word, fuse['word_dim']),
                         'layers': dec_layers},
        'mel_linear': {'w': mw, 'b': mb},
    }


def multi_head_attention(x, attn_bias, p, n_head):
    B, T, D = x.shape
    dk = D // n_head
    x2d = x.reshape(B * T, D)
    q = linear_pallas(x2d, p['wq'], p['bq']).reshape(B, T, n_head, dk)
    k = linear_pallas(x2d, p['wk'], p['bk']).reshape(B, T, n_head, dk)
    v = linear_pallas(x2d, p['wv'], p['bv']).reshape(B, T, n_head, dk)
    # head-major flatten, matching torch permute(2,0,1,3).view(-1, T, dk)
    q = jnp.transpose(q, (2, 0, 1, 3)).reshape(n_head * B, T, dk)
    k = jnp.transpose(k, (2, 0, 1, 3)).reshape(n_head * B, T, dk)
    v = jnp.transpose(v, (2, 0, 1, 3)).reshape(n_head * B, T, dk)
    bias = jnp.broadcast_to(attn_bias[None], (n_head, B, T, T)).reshape(
        n_head * B, T, T)
    ctx = attention_pallas(q, k, v, bias, scale=1.0 / math.sqrt(dk))
    ctx = jnp.transpose(ctx.reshape(n_head, B, T, dk), (1, 2, 0, 3)).reshape(
        B * T, n_head * dk)
    out = linear_pallas(ctx, p['fc_w'], p['fc_b'])             # dropout = identity
    out = layer_norm_pallas(out, p['ln_gb'], residual=x2d)     # LN(fc(out)+residual)
    return out.reshape(B, T, D)


def conv1d_layer(x, p, kernel_size):
    B, T, D = x.shape
    h = conv1d_pallas(x, p['w1'], p['b1'], kernel_size, activation='relu')
    y = conv1d_pallas(h, p['w2'], p['b2'], kernel_size)
    out = layer_norm_pallas(y.reshape(B * T, D), p['ln_gb'],
                            residual=x.reshape(B * T, D))
    return out.reshape(B, T, D)


def fft_block(x, mask, attn_bias, p, fft_cfg):
    h = multi_head_attention(x, attn_bias, p['attn'], fft_cfg['head_num'])
    h = jnp.where(mask[:, :, None], 0.0, h)
    h = conv1d_layer(h, p['conv'], fft_cfg['kernel_size'])
    h = jnp.where(mask[:, :, None], 0.0, h)
    return h


def encoder_forward(tokens, src_mask, p, pho_cfg):
    B, T = tokens.shape
    attn_bias = jnp.broadcast_to(
        jnp.where(src_mask, -1e30, 0.0).astype(jnp.float32)[:, None, :], (B, T, T))
    x = jnp.take(p['embed'], tokens, axis=0) + p['pos_enc'][:T][None]
    for lp in p['layers']:
        x = fft_block(x, src_mask, attn_bias, lp, pho_cfg['FFT'])
    return x


def length_predictor(x, src_mask, p, len_cfg):
    B, T, _ = x.shape
    fn = p['c1_w'].shape[1]
    k = len_cfg['kernel_size']
    h = conv1d_pallas(x, p['c1_w'], p['c1_b'], k, activation='relu')
    h = layer_norm_pallas(h.reshape(B * T, fn), p['ln1_gb']).reshape(B, T, fn)
    h = conv1d_pallas(h, p['c2_w'], p['c2_b'], k, activation='relu')
    h = layer_norm_pallas(h.reshape(B * T, fn), p['ln2_gb']).reshape(B, T, fn)
    d = linear_pallas(h.reshape(B * T, fn), p['lin_w'], p['lin_b']).reshape(B, T)
    return jnp.where(src_mask, 0.0, d)


def length_regulator(x, durations, max_len):
    # TODO(synk): the per-token repeat could become a Pallas scalar-prefetch
    # gather kernel; at these sizes a jnp cumsum+gather is simpler and not hot.
    dur = durations.astype(jnp.int32)
    csum = jnp.cumsum(dur, axis=1)                                # (B, T)
    mel_len = csum[:, -1]
    positions = jnp.arange(max_len)
    idx = jnp.sum(csum[:, None, :] <= positions[None, :, None], axis=-1)
    idx = jnp.clip(idx, 0, x.shape[1] - 1)
    out = jnp.take_along_axis(x, idx[:, :, None], axis=1)
    valid = positions[None, :] < mel_len[:, None]
    out = jnp.where(valid[:, :, None], out, 0.0)
    return out, mel_len


def length_adaptor(x, src_mask, p, len_cfg, mel_mask, max_len,
                   duration_target=None, d_control=1.0):
    log_d = length_predictor(x, src_mask, p, len_cfg)
    if duration_target is not None:
        x_out, mel_len = length_regulator(x, duration_target, max_len)
        dur_rounded = duration_target
    else:
        dur_rounded = jnp.maximum(jnp.round(jnp.exp(log_d) - 1.0) * d_control, 5.0)
        x_out, mel_len = length_regulator(x, dur_rounded, max_len)
        mel_mask = get_mask_from_lengths(mel_len, max_len)
    return x_out, log_d, dur_rounded, mel_len, mel_mask


def decoder_forward(x, mel_mask, p, fuse_cfg):
    B, T, _ = x.shape
    dec = x + p['pos_enc'][:T][None]
    attn_bias = jnp.broadcast_to(
        jnp.where(mel_mask, -1e30, 0.0).astype(jnp.float32)[:, None, :], (B, T, T))
    for lp in p['layers']:
        dec = fft_block(dec, mel_mask, attn_bias, lp, fuse_cfg['FFT'])
    return dec, mel_mask


def fastspeech_forward(params, cfg, tokens, src_lens, duration_target=None,
                       mel_lens=None, max_mel_len=None):
    B, max_src_len = tokens.shape
    src_mask = get_mask_from_lengths(src_lens, max_src_len)
    mel_mask = (get_mask_from_lengths(mel_lens, max_mel_len)
                if mel_lens is not None else None)
    pho = encoder_forward(tokens, src_mask, params['pho_encoder'],
                          cfg['pho_config'])
    fused, log_d, _dur, _mel_len, mel_mask = length_adaptor(
        pho, src_mask, params['length_adaptor'], cfg['len_config'],
        mel_mask, max_mel_len, duration_target=duration_target)
    fused, mel_mask = decoder_forward(fused, mel_mask, params['fuse_decoder'],
                                      cfg['fuse_config'])
    # TODO(synk): output_channel != 1 Conv2d channel-expansion branch not
    # implemented (default path output_channel == 1 skips it).
    B2, Tm, D = fused.shape
    mel = linear_pallas(fused.reshape(B2 * Tm, D), params['mel_linear']['w'],
                        params['mel_linear']['b'], activation='leaky_relu')
    return mel.reshape(B2, Tm, -1), log_d, mel_mask


# ----------------------------------------------------------------------------
# Config / self-check / main
# ----------------------------------------------------------------------------
EMBED_DIM = 32
MAX_MEL_LEN = 32
CONFIG = {
    'max_seq_len': 32,   # shared sinusoid table covers src (16) and mel (32)
    'pho_config': {
        'word_num': 20, 'word_dim': 32, 'padding_idx': 0, 'n_layers': 1,
        'FFT': {'hidden_dim': 32, 'filter_num': 32, 'kernel_size': 3,
                'dropout': 0.1, 'head_num': 2},
    },
    'len_config': {'filter_num': 32, 'kernel_size': 3, 'dropout': 0.1},
    'fuse_config': {
        'word_dim': 32, 'n_layers': 1,
        'FFT': {'hidden_dim': 32, 'filter_num': 32, 'kernel_size': 3,
                'dropout': 0.1, 'head_num': 2},
    },
}


def _self_check(key):
    """Kernel-vs-pure-JAX reference checks before running the full model."""
    kx, kr, kw, kb, kq, kk, kv = jax.random.split(key, 7)
    rows, C = 24, 32
    x = jax.random.normal(kx, (rows, C), jnp.float32)
    r = jax.random.normal(kr, (rows, C), jnp.float32)
    gb = jnp.stack([1.0 + 0.1 * jnp.arange(C, dtype=jnp.float32),
                    0.05 * jnp.arange(C, dtype=jnp.float32)])

    def ln_ref(z):
        mu = jnp.mean(z, -1, keepdims=True)
        var = jnp.mean((z - mu) ** 2, -1, keepdims=True)
        return (z - mu) * jax.lax.rsqrt(var + 1e-5) * gb[0] + gb[1]

    assert jnp.allclose(layer_norm_pallas(x, gb), ln_ref(x), atol=1e-5, rtol=1e-5)
    assert jnp.allclose(layer_norm_pallas(x, gb, residual=r), ln_ref(x + r),
                        atol=1e-5, rtol=1e-5)

    N = 48
    w = 0.1 * jax.random.normal(kw, (C, N), jnp.float32)
    b = 0.1 * jax.random.normal(kb, (N,), jnp.float32)
    lin_ref = jnp.maximum(
        jnp.dot(x, w, precision=jax.lax.Precision.HIGHEST) + b, 0.0)
    assert jnp.allclose(linear_pallas(x, w, b, activation='relu'), lin_ref,
                        atol=2e-3, rtol=2e-3)

    BH, L, dk = 4, 16, 16
    q = jax.random.normal(kq, (BH, L, dk), jnp.float32)
    k = jax.random.normal(kk, (BH, L, dk), jnp.float32)
    v = jax.random.normal(kv, (BH, L, dk), jnp.float32)
    mask = jnp.arange(L)[None, None, :] >= 12
    bias = jnp.broadcast_to(jnp.where(mask, -1e30, 0.0),
                            (BH, L, L)).astype(jnp.float32)
    scale = 1.0 / math.sqrt(dk)
    s = jnp.einsum('bqd,bkd->bqk', q, k,
                   precision=jax.lax.Precision.HIGHEST) * scale + bias
    attn_ref = jnp.einsum('bqk,bkd->bqd', jax.nn.softmax(s, axis=-1), v,
                          precision=jax.lax.Precision.HIGHEST)
    assert jnp.allclose(attention_pallas(q, k, v, bias, scale), attn_ref,
                        atol=2e-3, rtol=2e-3)


if __name__ == "__main__":
    key = jax.random.PRNGKey(0)
    k_check, k_par, k_tok = jax.random.split(key, 3)

    _self_check(k_check)

    params = init_fastspeech_params(k_par, CONFIG, EMBED_DIM)

    B, T_src = 2, 16
    word_num = CONFIG['pho_config']['word_num']
    tokens = jax.random.randint(k_tok, (B, T_src), 1, word_num)
    src_lens = jnp.array([16, 12], dtype=jnp.int32)
    pos = jnp.arange(T_src)[None, :]
    tokens = jnp.where(pos < src_lens[:, None], tokens, 0)      # padding_idx = 0
    duration_target = jnp.where(pos < src_lens[:, None], 2, 0).astype(jnp.int32)
    mel_lens = jnp.sum(duration_target, axis=1).astype(jnp.int32)   # [32, 24]

    @jax.jit
    def fwd(params, tokens, src_lens, duration_target, mel_lens):
        return fastspeech_forward(params, CONFIG, tokens, src_lens,
                                  duration_target=duration_target,
                                  mel_lens=mel_lens, max_mel_len=MAX_MEL_LEN)

    mel, log_dur, mel_mask = fwd(params, tokens, src_lens, duration_target,
                                 mel_lens)
    mel = jax.block_until_ready(mel)

    assert mel.shape == (B, MAX_MEL_LEN, EMBED_DIM), mel.shape
    assert log_dur.shape == (B, T_src), log_dur.shape
    assert mel_mask.shape == (B, MAX_MEL_LEN), mel_mask.shape
    assert bool(jnp.all(jnp.isfinite(mel)))
    assert bool(jnp.all(jnp.isfinite(log_dur)))

    print("KERNEL_OK")
</pallas_src>

<mosaic_0001>
module attributes {stable_mosaic.version = 11 : i64} {
  func.func @_ln_kernel(%arg0: i32, %arg1: memref<24x32xf32, #tpu.memory_space<vmem>>, %arg2: memref<2x32xf32, #tpu.memory_space<vmem>>, %arg3: memref<24x32xf32, #tpu.memory_space<vmem>>) attributes {dimension_semantics = [#tpu.dimension_semantics<parallel>], iteration_bounds = array<i64: 1>, scalar_prefetch = 0 : i64, scratch_operands = 0 : i64, tpu.core_type = #tpu.core_type<tc>, window_params = [{transform_indices = @transform_0, window_bounds = array<i64: 24, 32>}, {pipeline_mode = #tpu.pipeline_mode<synchronous>, transform_indices = @transform_1, window_bounds = array<i64: 2, 32>}, {transform_indices = @transform_2, window_bounds = array<i64: 24, 32>}]} {
    %c0 = arith.constant 0 : index
    %c0_0 = arith.constant 0 : index
    %0 = vector.load %arg1[%c0, %c0_0] : memref<24x32xf32, #tpu.memory_space<vmem>>, vector<24x32xf32>
    %cst = arith.constant dense<0.000000e+00> : vector<24xf32>
    %1 = vector.multi_reduction <add>, %0, %cst [1] : vector<24x32xf32> to vector<24xf32>
    %2 = vector.shape_cast %1 : vector<24xf32> to vector<24x1xf32>
    %cst_1 = arith.constant 3.200000e+01 : f32
    %3 = vector.broadcast %cst_1 : f32 to vector<24x1xf32>
    %4 = arith.divf %2, %3 : vector<24x1xf32>
    %5 = vector.broadcast %4 : vector<24x1xf32> to vector<24x32xf32>
    %6 = arith.subf %0, %5 : vector<24x32xf32>
    %7 = arith.mulf %6, %6 : vector<24x32xf32>
    %cst_2 = arith.constant dense<0.000000e+00> : vector<24xf32>
    %8 = vector.multi_reduction <add>, %7, %cst_2 [1] : vector<24x32xf32> to vector<24xf32>
    %9 = vector.shape_cast %8 : vector<24xf32> to vector<24x1xf32>
    %cst_3 = arith.constant 3.200000e+01 : f32
    %10 = vector.broadcast %cst_3 : f32 to vector<24x1xf32>
    %11 = arith.divf %9, %10 : vector<24x1xf32>
    %cst_4 = arith.constant 9.99999974E-6 : f32
    %12 = vector.broadcast %cst_4 : f32 to vector<24x1xf32>
    %13 = arith.addf %11, %12 : vector<24x1xf32>
    %14 = math.rsqrt %13 : vector<24x1xf32>
    %c0_5 = arith.constant 0 : index
    %c0_6 = arith.constant 0 : index
    %15 = vector.load %arg2[%c0_5, %c0_6] : memref<2x32xf32, #tpu.memory_space<vmem>>, vector<1x32xf32>
    %c1 = arith.constant 1 : index
    %c0_7 = arith.constant 0 : index
    %16 = vector.load %arg2[%c1, %c0_7] : memref<2x32xf32, #tpu.memory_space<vmem>>, vector<1x32xf32>
    %17 = vector.broadcast %14 : vector<24x1xf32> to vector<24x32xf32>
    %18 = arith.mulf %6, %17 : vector<24x32xf32>
    %19 = vector.broadcast %15 : vector<1x32xf32> to vector<24x32xf32>
    %20 = arith.mulf %18, %19 : vector<24x32xf32>
    %21 = vector.broadcast %16 : vector<1x32xf32> to vector<24x32xf32>
    %22 = arith.addf %20, %21 : vector<24x32xf32>
    %c0_8 = arith.constant 0 : index
    %c0_9 = arith.constant 0 : index
    %23 = vector.load %arg3[%c0_8, %c0_9] : memref<24x32xf32, #tpu.memory_space<vmem>>, vector<24x32xf32>
    tpu.vector_store %arg3[%c0_8, %c0_9], %22 {strides = array<i32>} : memref<24x32xf32, #tpu.memory_space<vmem>>, vector<24x32xf32>,
    return
  }
  func.func @transform_0(%arg0: i32) -> (i32, i32) {
    %c0_i32 = arith.constant 0 : i32
    %c0_i32_0 = arith.constant 0 : i32
    return %arg0, %c0_i32 : i32, i32
  }
  func.func @transform_1(%arg0: i32) -> (i32, i32) {
    %c0_i32 = arith.constant 0 : i32
    %c0_i32_0 = arith.constant 0 : i32
    %c0_i32_1 = arith.constant 0 : i32
    return %c0_i32, %c0_i32_0 : i32, i32
  }
  func.func @transform_2(%arg0: i32) -> (i32, i32) {
    %c0_i32 = arith.constant 0 : i32
    %c0_i32_0 = arith.constant 0 : i32
    return %arg0, %c0_i32 : i32, i32
  }
}

</mosaic_0001>

<bundles_post_ra>
// kernel: tpu_custom_call.1
= control target key start
LH: loop header
LB: loop body
LE: loop exit
PB: predicated region body
PF: predicated region fallthrough
CT: control target
= control target key end

     0   :  { %7 = vsyncpa [#allocation3], 0  ;;  %s230_s0 = inlined_call_operand.hbm [shape: f32[24,32], index: 0, kind: input, shape index: {}]   ;;  %s231_s1 = inlined_call_operand.vmem [shape: f32[2,32], index: 1, kind: input, shape index: {}]   ;;  %s232_s2 = inlined_call_operand.hbm [shape: f32[24,32], index: 2, kind: output, shape index: {}]  }
   0x1   :  { %8 = vsyncpa [#allocation4], 0  ;;  %s166_s9 = smov [#allocation2]   ;;  %s118_s13 = scalar_lea.hbm %s230_s0, 384 }
   0x2   :  { %s14_s10 = sshll.u32 %s166_s9, 4  ;;  %p119_p0 = scmp.ne.s32.totalorder %s230_s0, %s118_s13  ;;  %s15_s10 = int_to_ptr.vmem [resolvable:$true] %s14_s10 }
   0x3   :  { %p122_p1 = scmp.lt.u32.totalorder %s118_s13, %s230_s0 }
   0x5   :  { %p124_p2 = pnand %p122_p1, %p119_p0 }
   0x7   :  { %127 = shalt.err (!%p124_p2)
}
   0x8   :  { %s128_s18 = scalar_lea.vmem %s15_s10, 384  ;;  %p133_p4 = scmp.lt.s32.totalorder %s15_s10, %s15_s10 }
   0x9   :  { %p129_p3 = scmp.ne.s32.totalorder %s15_s10, %s128_s18  ;;  %p134_p5 = scmp.lt.s32.totalorder %s128_s18, %s128_s18 }
   0xb   :  { %p135_p6 = por %p134_p5, %p133_p4 }
   0xd   :  { %p136_p7 = pnand %p135_p6, %p129_p3 }
   0xf   :  { %139 = shalt.err (!%p136_p7)
}
  0x10   :  { %s167_s19 = smov 128   ;;  %s168_s20 = smov 8  }
  0x11   :  { %20 = dma.hbm_to_vmem [thread:$0]  %s230_s0, 384, %s15_s10, [#allocation3], %s167_s19, %s167_s19, %s168_s20  }
  0x12   :  { %162 = dma.done.wait [#allocation3], 384  }
  0x13   :  { %163 = vsyncadd [#allocation3], 4294966912  ;;  %vm29_vm0 = vcmask 261120   ;;  %v26_v0 = vld [vmem:[#allocation2] sm:$0xff]  ;;  %v28_v1 = vld [vmem:[#allocation2 + $0x10] sm:$0xff]  ;;  %s169_s26 = smov [#allocation5]  }
  0x14   :  { %v27_v2 = vld [vmem:[#allocation2 + $0x8] sm:$0xff]  ;;  %v30_v3 = vsel %vm29_vm0, %v26_v0, 0.0  ;;  %v36_v4 = vsel %vm29_vm0, %v28_v1, 0.0  ;;  %v106_v31 = vld [vmem:[%s231_s1] ss:$0 sm:$0xff]  ;;  %s94_s27 = sshll.u32 %s169_s26, 4  ;;  %s95_s27 = int_to_ptr.vmem [resolvable:$true] %s94_s27 }
  0x15   :  { %31 = vadd.xlane.f32.xlu0 %v30_v3  ;;  %37 = vadd.xlane.f32.xlu1 %v36_v4  ;;  %v33_v5 = vsel %vm29_vm0, %v27_v2, 0.0  ;;  %v107_v33 = vld [vmem:[%s231_s1 + $0x1] ss:$0 sm:$0xff]  ;;  %s140_s1 = scalar_lea.vmem %s95_s27, 384  ;;  %p145_p9 = scmp.lt.s32.totalorder %s95_s27, %s95_s27 }
  0x16   :  { %p141_p8 = scmp.ne.s32.totalorder %s95_s27, %s140_s1  ;;  %p146_p10 = scmp.lt.s32.totalorder %s140_s1, %s140_s1 }
  0x18   :  { %p147_p11 = por %p146_p10, %p145_p9 }
  0x19   :  { %34 = vadd.xlane.f32.xlu0 %v33_v5 }
  0x1a   :  { %p148_p12 = pnand %p147_p11, %p141_p8 }
  0xa2   :  { %v32_v6 = vpop.xlane.xlu0 %31  ;;  %v38_v7 = vpop.xlane.xlu1 %37 }
  0xa3   :  { %v40_v8 = vmul.f32 0.03125, %v32_v6  ;;  %v42_v9 = vmul.f32 0.03125, %v38_v7 }
  0xa5   :  { %v43_v10 = vsub.f32 %v26_v0, %v40_v8  ;;  %v45_v11 = vsub.f32 %v28_v1, %v42_v9 }
  0xa6   :  { %v35_v12 = vpop.xlane.xlu0 %34 }
  0xa7   :  { %v41_v13 = vmul.f32 0.03125, %v35_v12  ;;  %v46_v14 = vmul.f32 %v43_v10, %v43_v10  ;;  %v48_v15 = vmul.f32 %v45_v11, %v45_v11 }
  0xa9   :  { %v44_v16 = vsub.f32 %v27_v2, %v41_v13  ;;  %v49_v17 = vsel %vm29_vm0, %v46_v14, 0.0  ;;  %v55_v18 = vsel %vm29_vm0, %v48_v15, 0.0 }
  0xaa   :  { %50 = vadd.xlane.f32.xlu1 %v49_v17 }
  0xab   :  { %v47_v19 = vmul.f32 %v44_v16, %v44_v16 }
  0xad   :  { %v52_v20 = vsel %vm29_vm0, %v47_v19, 0.0 }
  0xae   :  { %56 = vadd.xlane.f32.xlu1 %v55_v18  ;;  %53 = vadd.xlane.f32.xlu0 %v52_v20 }
 0x137   :  { %v51_v21 = vpop.xlane.xlu1 %50 }
 0x138   :  { %v58_v22 = vmul.f32 0.03125, %v51_v21 }
 0x13a   :  { %v61_v23 = vadd.f32 1e-05, %v58_v22 }
 0x13b   :  { %v57_v24 = vpop.xlane.xlu1 %56  ;;  %v54_v25 = vpop.xlane.xlu0 %53 }
 0x13c   :  { %112 = vrsqrt.f32 %v61_v23  ;;  %v60_v26 = vmul.f32 0.03125, %v57_v24  ;;  %v59_v27 = vmul.f32 0.03125, %v54_v25 }
 0x13e   :  { %v63_v28 = vadd.f32 1e-05, %v60_v26  ;;  %v62_v29 = vadd.f32 1e-05, %v59_v27 }
 0x140   :  { %114 = vrsqrt.f32 %v63_v28 }
 0x141   :  { %116 = vrsqrt.f32 %v62_v29 }
 0x146   :  { %v113_v30 = vpop.eup %112 }
 0x147   :  { %v69_v32 = vmul.f32 %v113_v30, %v43_v10 }
 0x149   :  { %v76_v34 = vmul.f32 %v106_v31, %v69_v32 }
 0x14a   :  { %v115_v35 = vpop.eup %114 }
 0x14b   :  { %v117_v36 = vpop.eup %116  ;;  %v71_v37 = vmul.f32 %v115_v35, %v45_v11  ;;  %v83_v38 = vadd.f32 %v107_v33, %v76_v34 }
 0x14c   :  { %v70_v39 = vmul.f32 %v117_v36, %v44_v16 }
 0x14d   :  { %v78_v40 = vmul.f32 %v106_v31, %v71_v37  ;;  %86 = vst.msk [vmem:[#allocation5] sm:$0xff] %vm29_vm0, %v83_v38 }
 0x14e   :  { %v77_v41 = vmul.f32 %v106_v31, %v70_v39 }
 0x14f   :  { %v85_v42 = vadd.f32 %v107_v33, %v78_v40 }
 0x150   :  { %v84_v43 = vadd.f32 %v107_v33, %v77_v41 }
 0x151   :  { %88 = vst.msk [vmem:[#allocation5 + $0x10] sm:$0xff] %vm29_vm0, %v85_v42 }
 0x152   :  { %87 = vst.msk [vmem:[#allocation5 + $0x8] sm:$0xff] %vm29_vm0, %v84_v43 }
 0x153   :  { %151 = shalt.err (!%p148_p12)
}
 0x154   :  { %s152_s30 = scalar_lea.hbm %s232_s2, 384 }
 0x155   :  { %p153_p13 = scmp.ne.s32.totalorder %s232_s2, %s152_s30  ;;  %p156_p0 = scmp.lt.u32.totalorder %s152_s30, %s232_s2 }
 0x157   :  { %p158_p1 = pnand %p156_p0, %p153_p13 }
 0x159   :  { %161 = shalt.err (!%p158_p1)
}
 0x15a   :  { %100 = dma.vmem_to_hbm [thread:$0]  %s95_s27, 384, %s232_s2, [#allocation4], %s167_s19, %s167_s19, %s168_s20  }
 0x15b   :  { %164 = dma.done.wait [#allocation4], 384  }
 0x15c   :  { %165 = vsyncadd [#allocation4], 4294966912 }
 0x15d   :  { %104 = vsyncpa [#allocation3], 1 }
 0x15e   :  { %105 = vsyncpa [#allocation4], 1 }

</bundles_post_ra>
